<compile_context>
chip_gen: v7x
topology: tpu7x:2x2x1
jax: 0.10.0
libtpu: 0.0.40
codegen_flags: <defaults>
</compile_context>

<pallas_src>
import jax
import jax.numpy as jnp
from jax import lax
from jax.experimental import pallas as pl
from jax.experimental.pallas import tpu as pltpu


TRAIT_DIM = 12      # hidden / embedding size (fixed by the module)
NUM_SHELLS = 5      # len(shell_registry) for this synthetic instance
SEQ_LEN = 8         # length of usage_log
GATE_PAD = 128      # lane stride per GRU gate block (vreg-aligned slices)

_GI_ROWS = 8        # NUM_SHELLS padded to one sublane tile
_PACK_ROWS = 16     # TRAIT_DIM rows + bias row, padded to sublane tiles


def _exoghost_kernel(idx_ref, gi_ref, whh_ref, wout_ref, o_ref):
    """Fused embedding gather + GRU recurrence + Linear + softmax.

    idx_ref  : (T,)       usage_log, int32, SMEM (scalar prefetch)
    gi_ref   : (8, 3P)    precomputed emb@W_ih + b_ih (+ b_hr,b_hz), gates at 0/P/2P
    whh_ref  : (16, 3P)   rows 0..H-1 = W_hh (gates at 0/P/2P), row H = b_hn
    wout_ref : (16, P)    rows 0..H-1 = W_out, row H = b_out
    o_ref    : (1, N)     softmax priorities
    """
    H, P, T, N = TRAIT_DIM, GATE_PAD, SEQ_LEN, NUM_SHELLS

    # ---- Loop-invariant loads (issued once, off the serial chain). ---------
    whh = whh_ref[0:H, :]               # (H, 3P)
    bhh_n = whh_ref[H:H + 1, 0:H]       # (1, H)   hidden bias of the n gate
    wout = wout_ref[0:H, :]             # (H, P)   padded lanes are zero
    bout = wout_ref[H:H + 1, 0:N]       # (1, N)

    # Identity used to "flip" h from a lane-vector (1,H) into a sublane column
    # (H,1) via a masked lane reduction (XLU) - keeps the recurrence off the MXU.
    eye = (lax.broadcasted_iota(jnp.int32, (H, H), 0)
           == lax.broadcasted_iota(jnp.int32, (H, H), 1)).astype(jnp.float32)

    def gi_row(t):
        # Fused embedding gather + input projection: one dynamic row read of
        # the precomputed table, addressed from the SMEM-prefetched usage_log.
        return gi_ref[pl.ds(idx_ref[t], 1), :]                    # (1, 3P)

    # ---- t = 0 : h0 == 0, so W_hh @ h vanishes (b_hr/b_hz already folded). -
    gi0 = gi_row(0)
    rz = jax.nn.sigmoid(gi0[:, 0:2 * P])                          # fused r/z
    r = rz[:, 0:H]
    z = rz[:, P:P + H]
    n = jnp.tanh(gi0[:, 2 * P:2 * P + H] + r * bhh_n)
    h = (1.0 - z) * n                                             # (1, H)

    # ---- t = 1 .. T-1 : fully unrolled serial recurrence, VPU/XLU only. ----
    for t in range(1, T):
        gi_t = gi_row(t)
        # h (lane-vector) -> h_col (sublane column, lane-broadcastable).
        h_col = jnp.sum(eye * h, axis=1, keepdims=True)           # (H, 1)
        # gh[j] = sum_k h[k] * W_hh[k, j]  as broadcast-mul + sublane reduce.
        gh = jnp.sum(h_col * whh, axis=0, keepdims=True)          # (1, 3P)
        rz = jax.nn.sigmoid(gi_t[:, 0:2 * P] + gh[:, 0:2 * P])    # fused r/z
        r = rz[:, 0:H]
        z = rz[:, P:P + H]
        n = jnp.tanh(gi_t[:, 2 * P:2 * P + H]
                     + r * (gh[:, 2 * P:2 * P + H] + bhh_n))
        h = (1.0 - z) * n + z * h

    # ---- Output Linear + exact softmax (runs once, also MXU-free). ---------
    h_col = jnp.sum(eye * h, axis=1, keepdims=True)               # (H, 1)
    logits = jnp.sum(h_col * wout, axis=0, keepdims=True)[:, 0:N] + bout
    m = jnp.max(logits, axis=-1, keepdims=True)
    e = jnp.exp(logits - m)
    o_ref[...] = e / jnp.sum(e, axis=-1, keepdims=True)


@jax.jit
def exoghost_forward(usage_log, prepped):
    """Full ExoGhost.forward as one jitted pallas_call: usage_log -> priorities."""
    args = (prepped["gi_table"], prepped["whh"], prepped["wout"])
    grid_spec = pltpu.PrefetchScalarGridSpec(
        num_scalar_prefetch=1,          # usage_log -> SMEM, drives the row gather
        grid=(1,),
        in_specs=[pl.BlockSpec(a.shape, lambda i, idx_ref: (0, 0)) for a in args],
        out_specs=pl.BlockSpec((1, NUM_SHELLS), lambda i, idx_ref: (0, 0)),
    )
    out = pl.pallas_call(
        _exoghost_kernel,
        out_shape=jax.ShapeDtypeStruct((1, NUM_SHELLS), jnp.float32),
        grid_spec=grid_spec,
        compiler_params=pltpu.CompilerParams(
            dimension_semantics=("arbitrary",)),
    )(usage_log.astype(jnp.int32), *args)
    return out[0]                                          # (NUM_SHELLS,)


def prepare_params(params):
    """One-time host-side re-layout (review items 1, 2, 4).

    Fuses the embedding with the input->gate projection, folds the
    h-independent hidden biases (b_hr, b_hz), and packs everything into three
    (8,128)-aligned arrays so the kernel needs only 3 tensor DMAs.
    """
    H, P, N = TRAIT_DIM, GATE_PAD, NUM_SHELLS
    emb = params["embedding"].astype(jnp.float32)
    b_ih = params["b_ih"][0]
    b_hh = params["b_hh"][0]

    # (N, 3H): emb[n] @ W_ih + b_ih, plus b_hr/b_hz (h-independent -> foldable).
    gi = emb @ params["w_ih"] + b_ih
    gi = gi.at[:, 0:2 * H].add(b_hh[0:2 * H])

    gi_table = jnp.zeros((_GI_ROWS, 3 * P), jnp.float32)
    whh_pack = jnp.zeros((_PACK_ROWS, 3 * P), jnp.float32)
    for g in range(3):                               # gates (r,z,n) at lanes 0/P/2P
        gi_table = gi_table.at[:N, g * P:g * P + H].set(gi[:, g * H:(g + 1) * H])
        whh_pack = whh_pack.at[:H, g * P:g * P + H].set(
            params["w_hh"][:, g * H:(g + 1) * H])
    whh_pack = whh_pack.at[H, 0:H].set(b_hh[2 * H:3 * H])   # b_hn stays separate

    wout_pack = jnp.zeros((_PACK_ROWS, P), jnp.float32)
    wout_pack = wout_pack.at[:H, :N].set(params["w_out"])
    wout_pack = wout_pack.at[H, :N].set(params["b_out"][0])

    return {"gi_table": gi_table, "whh": whh_pack, "wout": wout_pack}


def _reference_forward(usage_log, params):
    """Pure-JAX reference (mirrors torch.nn.GRU math) for the correctness check."""
    H = TRAIT_DIM
    x = jnp.take(params["embedding"], usage_log, axis=0)          # (T, H)
    wih, whh = params["w_ih"], params["w_hh"]
    bih, bhh = params["b_ih"][0], params["b_hh"][0]

    def step(h, x_t):
        gi = x_t @ wih + bih
        gh = h @ whh + bhh
        r = jax.nn.sigmoid(gi[0:H] + gh[0:H])
        z = jax.nn.sigmoid(gi[H:2 * H] + gh[H:2 * H])
        n = jnp.tanh(gi[2 * H:] + r * gh[2 * H:])
        h_new = (1.0 - z) * n + z * h
        return h_new, h_new

    h_last, _ = lax.scan(step, jnp.zeros((H,), jnp.float32), x)
    logits = h_last @ params["w_out"] + params["b_out"][0]
    return jax.nn.softmax(logits, axis=0)


def init_params(key):
    """Deterministic synthetic parameters (shapes from ExoGhost.__init__)."""
    H, N = TRAIT_DIM, NUM_SHELLS
    ks = jax.random.split(key, 7)
    scale = 1.0 / jnp.sqrt(jnp.float32(H))
    u = lambda k, shape: jax.random.uniform(k, shape, jnp.float32, -scale, scale)
    return {
        "embedding": jax.random.normal(ks[0], (N, H), jnp.float32),
        # PyTorch GRU weights are (3H, in) / (3H, H); stored transposed here.
        "w_ih": u(ks[1], (H, 3 * H)),
        "w_hh": u(ks[2], (H, 3 * H)),
        "b_ih": u(ks[3], (1, 3 * H)),
        "b_hh": u(ks[4], (1, 3 * H)),
        # PyTorch Linear weight is (N, H); stored transposed here.
        "w_out": u(ks[5], (H, N)),
        "b_out": u(ks[6], (1, N)),
    }


if __name__ == "__main__":
    key = jax.random.PRNGKey(0)
    k_params, k_log = jax.random.split(key)
    params = init_params(k_params)
    prepped = prepare_params(params)

    # usage_log: sequence of shell indices, shape (SEQ_LEN,), int32.
    usage_log = jax.random.randint(k_log, (SEQ_LEN,), 0, NUM_SHELLS,
                                   dtype=jnp.int32)

    priorities = exoghost_forward(usage_log, prepped)
    priorities = jax.block_until_ready(priorities)

    ref = _reference_forward(usage_log, params)
    assert priorities.shape == (NUM_SHELLS,)
    # Exact softmax (no approx reciprocal) -> tight parity with the reference.
    assert jnp.allclose(jnp.sum(priorities), 1.0, atol=1e-5)
    assert jnp.allclose(priorities, ref, atol=1e-4, rtol=1e-4)

    print("KERNEL_OK")
</pallas_src>

<mosaic_0001>
module attributes {stable_mosaic.version = 11 : i64} {
  func.func @_exoghost_kernel(%arg0: i32, %arg1: memref<8xi32, #tpu.memory_space<smem>>, %arg2: memref<8x384xf32, #tpu.memory_space<vmem>>, %arg3: memref<16x384xf32, #tpu.memory_space<vmem>>, %arg4: memref<16x128xf32, #tpu.memory_space<vmem>>, %arg5: memref<1x5xf32, #tpu.memory_space<vmem>>) attributes {dimension_semantics = [#tpu.dimension_semantics<arbitrary>], iteration_bounds = array<i64: 1>, scalar_prefetch = 1 : i64, scratch_operands = 0 : i64, tpu.core_type = #tpu.core_type<tc>, window_params = [{pipeline_mode = #tpu.pipeline_mode<synchronous>, transform_indices = @transform_0, window_bounds = array<i64: 8, 384>}, {pipeline_mode = #tpu.pipeline_mode<synchronous>, transform_indices = @transform_1, window_bounds = array<i64: 16, 384>}, {pipeline_mode = #tpu.pipeline_mode<synchronous>, transform_indices = @transform_2, window_bounds = array<i64: 16, 128>}, {pipeline_mode = #tpu.pipeline_mode<synchronous>, transform_indices = @transform_3, window_bounds = array<i64: 1, 5>}]} {
    %c0 = arith.constant 0 : index
    %c0_0 = arith.constant 0 : index
    %0 = vector.load %arg3[%c0, %c0_0] : memref<16x384xf32, #tpu.memory_space<vmem>>, vector<12x384xf32>
    %c12 = arith.constant 12 : index
    %c0_1 = arith.constant 0 : index
    %1 = vector.load %arg3[%c12, %c0_1] : memref<16x384xf32, #tpu.memory_space<vmem>>, vector<1x12xf32>
    %c0_2 = arith.constant 0 : index
    %c0_3 = arith.constant 0 : index
    %2 = vector.load %arg4[%c0_2, %c0_3] : memref<16x128xf32, #tpu.memory_space<vmem>>, vector<12x128xf32>
    %c12_4 = arith.constant 12 : index
    %c0_5 = arith.constant 0 : index
    %3 = vector.load %arg4[%c12_4, %c0_5] : memref<16x128xf32, #tpu.memory_space<vmem>>, vector<1x5xf32>
    %4 = tpu.iota {dimensions = array<i32: 0>} : vector<12x12xi32>
    %5 = tpu.iota {dimensions = array<i32: 1>} : vector<12x12xi32>
    %6 = arith.cmpi eq, %4, %5 : vector<12x12xi32>
    %7 = arith.extui %6 : vector<12x12xi1> to vector<12x12xi32>
    %8 = arith.sitofp %7 : vector<12x12xi32> to vector<12x12xf32>
    %c0_6 = arith.constant 0 : index
    %9 = memref.load %arg1[%c0_6] : memref<8xi32, #tpu.memory_space<smem>>
    %10 = arith.index_cast %9 : i32 to index
    %c0_7 = arith.constant 0 : index
    %11 = vector.load %arg2[%10, %c0_7] : memref<8x384xf32, #tpu.memory_space<vmem>>, vector<1x384xf32>
    %12 = vector.extract_strided_slice %11 {offsets = [0, 0], sizes = [1, 256], strides = [1, 1]} : vector<1x384xf32> to vector<1x256xf32>
    %13 = arith.negf %12 : vector<1x256xf32>
    %14 = math.exp %13 : vector<1x256xf32>
    %cst = arith.constant 1.000000e+00 : f32
    %15 = vector.broadcast %cst : f32 to vector<1x256xf32>
    %16 = arith.addf %15, %14 : vector<1x256xf32>
    %17 = arith.divf %15, %16 : vector<1x256xf32>
    %18 = vector.extract_strided_slice %17 {offsets = [0, 0], sizes = [1, 12], strides = [1, 1]} : vector<1x256xf32> to vector<1x12xf32>
    %19 = vector.extract_strided_slice %17 {offsets = [0, 128], sizes = [1, 12], strides = [1, 1]} : vector<1x256xf32> to vector<1x12xf32>
    %20 = vector.extract_strided_slice %11 {offsets = [0, 256], sizes = [1, 12], strides = [1, 1]} : vector<1x384xf32> to vector<1x12xf32>
    %21 = arith.mulf %18, %1 : vector<1x12xf32>
    %22 = arith.addf %20, %21 : vector<1x12xf32>
    %23 = math.tanh %22 : vector<1x12xf32>
    %cst_8 = arith.constant 1.000000e+00 : f32
    %24 = vector.broadcast %cst_8 : f32 to vector<1x12xf32>
    %25 = arith.subf %24, %19 : vector<1x12xf32>
    %26 = arith.mulf %25, %23 : vector<1x12xf32>
    %c1 = arith.constant 1 : index
    %27 = memref.load %arg1[%c1] : memref<8xi32, #tpu.memory_space<smem>>
    %28 = arith.index_cast %27 : i32 to index
    %c0_9 = arith.constant 0 : index
    %29 = vector.load %arg2[%28, %c0_9] : memref<8x384xf32, #tpu.memory_space<vmem>>, vector<1x384xf32>
    %30 = vector.broadcast %26 : vector<1x12xf32> to vector<12x12xf32>
    %31 = arith.mulf %8, %30 : vector<12x12xf32>
    %cst_10 = arith.constant dense<0.000000e+00> : vector<12xf32>
    %32 = vector.multi_reduction <add>, %31, %cst_10 [1] : vector<12x12xf32> to vector<12xf32>
    %33 = vector.shape_cast %32 : vector<12xf32> to vector<12x1xf32>
    %34 = vector.broadcast %33 : vector<12x1xf32> to vector<12x384xf32>
    %35 = arith.mulf %34, %0 : vector<12x384xf32>
    %cst_11 = arith.constant dense<0.000000e+00> : vector<384xf32>
    %36 = vector.multi_reduction <add>, %35, %cst_11 [0] : vector<12x384xf32> to vector<384xf32>
    %37 = vector.shape_cast %36 : vector<384xf32> to vector<1x384xf32>
    %38 = vector.extract_strided_slice %29 {offsets = [0, 0], sizes = [1, 256], strides = [1, 1]} : vector<1x384xf32> to vector<1x256xf32>
    %39 = vector.extract_strided_slice %37 {offsets = [0, 0], sizes = [1, 256], strides = [1, 1]} : vector<1x384xf32> to vector<1x256xf32>
    %40 = arith.addf %38, %39 : vector<1x256xf32>
    %41 = arith.negf %40 : vector<1x256xf32>
    %42 = math.exp %41 : vector<1x256xf32>
    %cst_12 = arith.constant 1.000000e+00 : f32
    %43 = vector.broadcast %cst_12 : f32 to vector<1x256xf32>
    %44 = arith.addf %43, %42 : vector<1x256xf32>
    %45 = arith.divf %43, %44 : vector<1x256xf32>
    %46 = vector.extract_strided_slice %45 {offsets = [0, 0], sizes = [1, 12], strides = [1, 1]} : vector<1x256xf32> to vector<1x12xf32>
    %47 = vector.extract_strided_slice %45 {offsets = [0, 128], sizes = [1, 12], strides = [1, 1]} : vector<1x256xf32> to vector<1x12xf32>
    %48 = vector.extract_strided_slice %29 {offsets = [0, 256], sizes = [1, 12], strides = [1, 1]} : vector<1x384xf32> to vector<1x12xf32>
    %49 = vector.extract_strided_slice %37 {offsets = [0, 256], sizes = [1, 12], strides = [1, 1]} : vector<1x384xf32> to vector<1x12xf32>
    %50 = arith.addf %49, %1 : vector<1x12xf32>
    %51 = arith.mulf %46, %50 : vector<1x12xf32>
    %52 = arith.addf %48, %51 : vector<1x12xf32>
    %53 = math.tanh %52 : vector<1x12xf32>
    %cst_13 = arith.constant 1.000000e+00 : f32
    %54 = vector.broadcast %cst_13 : f32 to vector<1x12xf32>
    %55 = arith.subf %54, %47 : vector<1x12xf32>
    %56 = arith.mulf %55, %53 : vector<1x12xf32>
    %57 = arith.mulf %47, %26 : vector<1x12xf32>
    %58 = arith.addf %56, %57 : vector<1x12xf32>
    %c2 = arith.constant 2 : index
    %59 = memref.load %arg1[%c2] : memref<8xi32, #tpu.memory_space<smem>>
    %60 = arith.index_cast %59 : i32 to index
    %c0_14 = arith.constant 0 : index
    %61 = vector.load %arg2[%60, %c0_14] : memref<8x384xf32, #tpu.memory_space<vmem>>, vector<1x384xf32>
    %62 = vector.broadcast %58 : vector<1x12xf32> to vector<12x12xf32>
    %63 = arith.mulf %8, %62 : vector<12x12xf32>
    %cst_15 = arith.constant dense<0.000000e+00> : vector<12xf32>
    %64 = vector.multi_reduction <add>, %63, %cst_15 [1] : vector<12x12xf32> to vector<12xf32>
    %65 = vector.shape_cast %64 : vector<12xf32> to vector<12x1xf32>
    %66 = vector.broadcast %65 : vector<12x1xf32> to vector<12x384xf32>
    %67 = arith.mulf %66, %0 : vector<12x384xf32>
    %cst_16 = arith.constant dense<0.000000e+00> : vector<384xf32>
    %68 = vector.multi_reduction <add>, %67, %cst_16 [0] : vector<12x384xf32> to vector<384xf32>
    %69 = vector.shape_cast %68 : vector<384xf32> to vector<1x384xf32>
    %70 = vector.extract_strided_slice %61 {offsets = [0, 0], sizes = [1, 256], strides = [1, 1]} : vector<1x384xf32> to vector<1x256xf32>
    %71 = vector.extract_strided_slice %69 {offsets = [0, 0], sizes = [1, 256], strides = [1, 1]} : vector<1x384xf32> to vector<1x256xf32>
    %72 = arith.addf %70, %71 : vector<1x256xf32>
    %73 = arith.negf %72 : vector<1x256xf32>
    %74 = math.exp %73 : vector<1x256xf32>
    %cst_17 = arith.constant 1.000000e+00 : f32
    %75 = vector.broadcast %cst_17 : f32 to vector<1x256xf32>
    %76 = arith.addf %75, %74 : vector<1x256xf32>
    %77 = arith.divf %75, %76 : vector<1x256xf32>
    %78 = vector.extract_strided_slice %77 {offsets = [0, 0], sizes = [1, 12], strides = [1, 1]} : vector<1x256xf32> to vector<1x12xf32>
    %79 = vector.extract_strided_slice %77 {offsets = [0, 128], sizes = [1, 12], strides = [1, 1]} : vector<1x256xf32> to vector<1x12xf32>
    %80 = vector.extract_strided_slice %61 {offsets = [0, 256], sizes = [1, 12], strides = [1, 1]} : vector<1x384xf32> to vector<1x12xf32>
    %81 = vector.extract_strided_slice %69 {offsets = [0, 256], sizes = [1, 12], strides = [1, 1]} : vector<1x384xf32> to vector<1x12xf32>
    %82 = arith.addf %81, %1 : vector<1x12xf32>
    %83 = arith.mulf %78, %82 : vector<1x12xf32>
    %84 = arith.addf %80, %83 : vector<1x12xf32>
    %85 = math.tanh %84 : vector<1x12xf32>
    %cst_18 = arith.constant 1.000000e+00 : f32
    %86 = vector.broadcast %cst_18 : f32 to vector<1x12xf32>
    %87 = arith.subf %86, %79 : vector<1x12xf32>
    %88 = arith.mulf %87, %85 : vector<1x12xf32>
    %89 = arith.mulf %79, %58 : vector<1x12xf32>
    %90 = arith.addf %88, %89 : vector<1x12xf32>
    %c3 = arith.constant 3 : index
    %91 = memref.load %arg1[%c3] : memref<8xi32, #tpu.memory_space<smem>>
    %92 = arith.index_cast %91 : i32 to index
    %c0_19 = arith.constant 0 : index
    %93 = vector.load %arg2[%92, %c0_19] : memref<8x384xf32, #tpu.memory_space<vmem>>, vector<1x384xf32>
    %94 = vector.broadcast %90 : vector<1x12xf32> to vector<12x12xf32>
    %95 = arith.mulf %8, %94 : vector<12x12xf32>
    %cst_20 = arith.constant dense<0.000000e+00> : vector<12xf32>
    %96 = vector.multi_reduction <add>, %95, %cst_20 [1] : vector<12x12xf32> to vector<12xf32>
    %97 = vector.shape_cast %96 : vector<12xf32> to vector<12x1xf32>
    %98 = vector.broadcast %97 : vector<12x1xf32> to vector<12x384xf32>
    %99 = arith.mulf %98, %0 : vector<12x384xf32>
    %cst_21 = arith.constant dense<0.000000e+00> : vector<384xf32>
    %100 = vector.multi_reduction <add>, %99, %cst_21 [0] : vector<12x384xf32> to vector<384xf32>
    %101 = vector.shape_cast %100 : vector<384xf32> to vector<1x384xf32>
    %102 = vector.extract_strided_slice %93 {offsets = [0, 0], sizes = [1, 256], strides = [1, 1]} : vector<1x384xf32> to vector<1x256xf32>
    %103 = vector.extract_strided_slice %101 {offsets = [0, 0], sizes = [1, 256], strides = [1, 1]} : vector<1x384xf32> to vector<1x256xf32>
    %104 = arith.addf %102, %103 : vector<1x256xf32>
    %105 = arith.negf %104 : vector<1x256xf32>
    %106 = math.exp %105 : vector<1x256xf32>
    %cst_22 = arith.constant 1.000000e+00 : f32
    %107 = vector.broadcast %cst_22 : f32 to vector<1x256xf32>
    %108 = arith.addf %107, %106 : vector<1x256xf32>
    %109 = arith.divf %107, %108 : vector<1x256xf32>
    %110 = vector.extract_strided_slice %109 {offsets = [0, 0], sizes = [1, 12], strides = [1, 1]} : vector<1x256xf32> to vector<1x12xf32>
    %111 = vector.extract_strided_slice %109 {offsets = [0, 128], sizes = [1, 12], strides = [1, 1]} : vector<1x256xf32> to vector<1x12xf32>
    %112 = vector.extract_strided_slice %93 {offsets = [0, 256], sizes = [1, 12], strides = [1, 1]} : vector<1x384xf32> to vector<1x12xf32>
    %113 = vector.extract_strided_slice %101 {offsets = [0, 256], sizes = [1, 12], strides = [1, 1]} : vector<1x384xf32> to vector<1x12xf32>
    %114 = arith.addf %113, %1 : vector<1x12xf32>
    %115 = arith.mulf %110, %114 : vector<1x12xf32>
    %116 = arith.addf %112, %115 : vector<1x12xf32>
    %117 = math.tanh %116 : vector<1x12xf32>
    %cst_23 = arith.constant 1.000000e+00 : f32
    %118 = vector.broadcast %cst_23 : f32 to vector<1x12xf32>
    %119 = arith.subf %118, %111 : vector<1x12xf32>
    %120 = arith.mulf %119, %117 : vector<1x12xf32>
    %121 = arith.mulf %111, %90 : vector<1x12xf32>
    %122 = arith.addf %120, %121 : vector<1x12xf32>
    %c4 = arith.constant 4 : index
    %123 = memref.load %arg1[%c4] : memref<8xi32, #tpu.memory_space<smem>>
    %124 = arith.index_cast %123 : i32 to index
    %c0_24 = arith.constant 0 : index
    %125 = vector.load %arg2[%124, %c0_24] : memref<8x384xf32, #tpu.memory_space<vmem>>, vector<1x384xf32>
    %126 = vector.broadcast %122 : vector<1x12xf32> to vector<12x12xf32>
    %127 = arith.mulf %8, %126 : vector<12x12xf32>
    %cst_25 = arith.constant dense<0.000000e+00> : vector<12xf32>
    %128 = vector.multi_reduction <add>, %127, %cst_25 [1] : vector<12x12xf32> to vector<12xf32>
    %129 = vector.shape_cast %128 : vector<12xf32> to vector<12x1xf32>
    %130 = vector.broadcast %129 : vector<12x1xf32> to vector<12x384xf32>
    %131 = arith.mulf %130, %0 : vector<12x384xf32>
    %cst_26 = arith.constant dense<0.000000e+00> : vector<384xf32>
    %132 = vector.multi_reduction <add>, %131, %cst_26 [0] : vector<12x384xf32> to vector<384xf32>
    %133 = vector.shape_cast %132 : vector<384xf32> to vector<1x384xf32>
    %134 = vector.extract_strided_slice %125 {offsets = [0, 0], sizes = [1, 256], strides = [1, 1]} : vector<1x384xf32> to vector<1x256xf32>
    %135 = vector.extract_strided_slice %133 {offsets = [0, 0], sizes = [1, 256], strides = [1, 1]} : vector<1x384xf32> to vector<1x256xf32>
    %136 = arith.addf %134, %135 : vector<1x256xf32>
    %137 = arith.negf %136 : vector<1x256xf32>
    %138 = math.exp %137 : vector<1x256xf32>
    %cst_27 = arith.constant 1.000000e+00 : f32
    %139 = vector.broadcast %cst_27 : f32 to vector<1x256xf32>
    %140 = arith.addf %139, %138 : vector<1x256xf32>
    %141 = arith.divf %139, %140 : vector<1x256xf32>
    %142 = vector.extract_strided_slice %141 {offsets = [0, 0], sizes = [1, 12], strides = [1, 1]} : vector<1x256xf32> to vector<1x12xf32>
    %143 = vector.extract_strided_slice %141 {offsets = [0, 128], sizes = [1, 12], strides = [1, 1]} : vector<1x256xf32> to vector<1x12xf32>
    %144 = vector.extract_strided_slice %125 {offsets = [0, 256], sizes = [1, 12], strides = [1, 1]} : vector<1x384xf32> to vector<1x12xf32>
    %145 = vector.extract_strided_slice %133 {offsets = [0, 256], sizes = [1, 12], strides = [1, 1]} : vector<1x384xf32> to vector<1x12xf32>
    %146 = arith.addf %145, %1 : vector<1x12xf32>
    %147 = arith.mulf %142, %146 : vector<1x12xf32>
    %148 = arith.addf %144, %147 : vector<1x12xf32>
    %149 = math.tanh %148 : vector<1x12xf32>
    %cst_28 = arith.constant 1.000000e+00 : f32
    %150 = vector.broadcast %cst_28 : f32 to vector<1x12xf32>
    %151 = arith.subf %150, %143 : vector<1x12xf32>
    %152 = arith.mulf %151, %149 : vector<1x12xf32>
    %153 = arith.mulf %143, %122 : vector<1x12xf32>
    %154 = arith.addf %152, %153 : vector<1x12xf32>
    %c5 = arith.constant 5 : index
    %155 = memref.load %arg1[%c5] : memref<8xi32, #tpu.memory_space<smem>>
    %156 = arith.index_cast %155 : i32 to index
    %c0_29 = arith.constant 0 : index
    %157 = vector.load %arg2[%156, %c0_29] : memref<8x384xf32, #tpu.memory_space<vmem>>, vector<1x384xf32>
    %158 = vector.broadcast %154 : vector<1x12xf32> to vector<12x12xf32>
    %159 = arith.mulf %8, %158 : vector<12x12xf32>
    %cst_30 = arith.constant dense<0.000000e+00> : vector<12xf32>
    %160 = vector.multi_reduction <add>, %159, %cst_30 [1] : vector<12x12xf32> to vector<12xf32>
    %161 = vector.shape_cast %160 : vector<12xf32> to vector<12x1xf32>
    %162 = vector.broadcast %161 : vector<12x1xf32> to vector<12x384xf32>
    %163 = arith.mulf %162, %0 : vector<12x384xf32>
    %cst_31 = arith.constant dense<0.000000e+00> : vector<384xf32>
    %164 = vector.multi_reduction <add>, %163, %cst_31 [0] : vector<12x384xf32> to vector<384xf32>
    %165 = vector.shape_cast %164 : vector<384xf32> to vector<1x384xf32>
    %166 = vector.extract_strided_slice %157 {offsets = [0, 0], sizes = [1, 256], strides = [1, 1]} : vector<1x384xf32> to vector<1x256xf32>
    %167 = vector.extract_strided_slice %165 {offsets = [0, 0], sizes = [1, 256], strides = [1, 1]} : vector<1x384xf32> to vector<1x256xf32>
    %168 = arith.addf %166, %167 : vector<1x256xf32>
    %169 = arith.negf %168 : vector<1x256xf32>
    %170 = math.exp %169 : vector<1x256xf32>
    %cst_32 = arith.constant 1.000000e+00 : f32
    %171 = vector.broadcast %cst_32 : f32 to vector<1x256xf32>
    %172 = arith.addf %171, %170 : vector<1x256xf32>
    %173 = arith.divf %171, %172 : vector<1x256xf32>
    %174 = vector.extract_strided_slice %173 {offsets = [0, 0], sizes = [1, 12], strides = [1, 1]} : vector<1x256xf32> to vector<1x12xf32>
    %175 = vector.extract_strided_slice %173 {offsets = [0, 128], sizes = [1, 12], strides = [1, 1]} : vector<1x256xf32> to vector<1x12xf32>
    %176 = vector.extract_strided_slice %157 {offsets = [0, 256], sizes = [1, 12], strides = [1, 1]} : vector<1x384xf32> to vector<1x12xf32>
    %177 = vector.extract_strided_slice %165 {offsets = [0, 256], sizes = [1, 12], strides = [1, 1]} : vector<1x384xf32> to vector<1x12xf32>
    %178 = arith.addf %177, %1 : vector<1x12xf32>
    %179 = arith.mulf %174, %178 : vector<1x12xf32>
    %180 = arith.addf %176, %179 : vector<1x12xf32>
    %181 = math.tanh %180 : vector<1x12xf32>
    %cst_33 = arith.constant 1.000000e+00 : f32
    %182 = vector.broadcast %cst_33 : f32 to vector<1x12xf32>
    %183 = arith.subf %182, %175 : vector<1x12xf32>
    %184 = arith.mulf %183, %181 : vector<1x12xf32>
    %185 = arith.mulf %175, %154 : vector<1x12xf32>
    %186 = arith.addf %184, %185 : vector<1x12xf32>
    %c6 = arith.constant 6 : index
    %187 = memref.load %arg1[%c6] : memref<8xi32, #tpu.memory_space<smem>>
    %188 = arith.index_cast %187 : i32 to index
    %c0_34 = arith.constant 0 : index
    %189 = vector.load %arg2[%188, %c0_34] : memref<8x384xf32, #tpu.memory_space<vmem>>, vector<1x384xf32>
    %190 = vector.broadcast %186 : vector<1x12xf32> to vector<12x12xf32>
    %191 = arith.mulf %8, %190 : vector<12x12xf32>
    %cst_35 = arith.constant dense<0.000000e+00> : vector<12xf32>
    %192 = vector.multi_reduction <add>, %191, %cst_35 [1] : vector<12x12xf32> to vector<12xf32>
    %193 = vector.shape_cast %192 : vector<12xf32> to vector<12x1xf32>
    %194 = vector.broadcast %193 : vector<12x1xf32> to vector<12x384xf32>
    %195 = arith.mulf %194, %0 : vector<12x384xf32>
    %cst_36 = arith.constant dense<0.000000e+00> : vector<384xf32>
    %196 = vector.multi_reduction <add>, %195, %cst_36 [0] : vector<12x384xf32> to vector<384xf32>
    %197 = vector.shape_cast %196 : vector<384xf32> to vector<1x384xf32>
    %198 = vector.extract_strided_slice %189 {offsets = [0, 0], sizes = [1, 256], strides = [1, 1]} : vector<1x384xf32> to vector<1x256xf32>
    %199 = vector.extract_strided_slice %197 {offsets = [0, 0], sizes = [1, 256], strides = [1, 1]} : vector<1x384xf32> to vector<1x256xf32>
    %200 = arith.addf %198, %199 : vector<1x256xf32>
    %201 = arith.negf %200 : vector<1x256xf32>
    %202 = math.exp %201 : vector<1x256xf32>
    %cst_37 = arith.constant 1.000000e+00 : f32
    %203 = vector.broadcast %cst_37 : f32 to vector<1x256xf32>
    %204 = arith.addf %203, %202 : vector<1x256xf32>
    %205 = arith.divf %203, %204 : vector<1x256xf32>
    %206 = vector.extract_strided_slice %205 {offsets = [0, 0], sizes = [1, 12], strides = [1, 1]} : vector<1x256xf32> to vector<1x12xf32>
    %207 = vector.extract_strided_slice %205 {offsets = [0, 128], sizes = [1, 12], strides = [1, 1]} : vector<1x256xf32> to vector<1x12xf32>
    %208 = vector.extract_strided_slice %189 {offsets = [0, 256], sizes = [1, 12], strides = [1, 1]} : vector<1x384xf32> to vector<1x12xf32>
    %209 = vector.extract_strided_slice %197 {offsets = [0, 256], sizes = [1, 12], strides = [1, 1]} : vector<1x384xf32> to vector<1x12xf32>
    %210 = arith.addf %209, %1 : vector<1x12xf32>
    %211 = arith.mulf %206, %210 : vector<1x12xf32>
    %212 = arith.addf %208, %211 : vector<1x12xf32>
    %213 = math.tanh %212 : vector<1x12xf32>
    %cst_38 = arith.constant 1.000000e+00 : f32
    %214 = vector.broadcast %cst_38 : f32 to vector<1x12xf32>
    %215 = arith.subf %214, %207 : vector<1x12xf32>
    %216 = arith.mulf %215, %213 : vector<1x12xf32>
    %217 = arith.mulf %207, %186 : vector<1x12xf32>
    %218 = arith.addf %216, %217 : vector<1x12xf32>
    %c7 = arith.constant 7 : index
    %219 = memref.load %arg1[%c7] : memref<8xi32, #tpu.memory_space<smem>>
    %220 = arith.index_cast %219 : i32 to index
    %c0_39 = arith.constant 0 : index
    %221 = vector.load %arg2[%220, %c0_39] : memref<8x384xf32, #tpu.memory_space<vmem>>, vector<1x384xf32>
    %222 = vector.broadcast %218 : vector<1x12xf32> to vector<12x12xf32>
    %223 = arith.mulf %8, %222 : vector<12x12xf32>
    %cst_40 = arith.constant dense<0.000000e+00> : vector<12xf32>
    %224 = vector.multi_reduction <add>, %223, %cst_40 [1] : vector<12x12xf32> to vector<12xf32>
    %225 = vector.shape_cast %224 : vector<12xf32> to vector<12x1xf32>
    %226 = vector.broadcast %225 : vector<12x1xf32> to vector<12x384xf32>
    %227 = arith.mulf %226, %0 : vector<12x384xf32>
    %cst_41 = arith.constant dense<0.000000e+00> : vector<384xf32>
    %228 = vector.multi_reduction <add>, %227, %cst_41 [0] : vector<12x384xf32> to vector<384xf32>
    %229 = vector.shape_cast %228 : vector<384xf32> to vector<1x384xf32>
    %230 = vector.extract_strided_slice %221 {offsets = [0, 0], sizes = [1, 256], strides = [1, 1]} : vector<1x384xf32> to vector<1x256xf32>
    %231 = vector.extract_strided_slice %229 {offsets = [0, 0], sizes = [1, 256], strides = [1, 1]} : vector<1x384xf32> to vector<1x256xf32>
    %232 = arith.addf %230, %231 : vector<1x256xf32>
    %233 = arith.negf %232 : vector<1x256xf32>
    %234 = math.exp %233 : vector<1x256xf32>
    %cst_42 = arith.constant 1.000000e+00 : f32
    %235 = vector.broadcast %cst_42 : f32 to vector<1x256xf32>
    %236 = arith.addf %235, %234 : vector<1x256xf32>
    %237 = arith.divf %235, %236 : vector<1x256xf32>
    %238 = vector.extract_strided_slice %237 {offsets = [0, 0], sizes = [1, 12], strides = [1, 1]} : vector<1x256xf32> to vector<1x12xf32>
    %239 = vector.extract_strided_slice %237 {offsets = [0, 128], sizes = [1, 12], strides = [1, 1]} : vector<1x256xf32> to vector<1x12xf32>
    %240 = vector.extract_strided_slice %221 {offsets = [0, 256], sizes = [1, 12], strides = [1, 1]} : vector<1x384xf32> to vector<1x12xf32>
    %241 = vector.extract_strided_slice %229 {offsets = [0, 256], sizes = [1, 12], strides = [1, 1]} : vector<1x384xf32> to vector<1x12xf32>
    %242 = arith.addf %241, %1 : vector<1x12xf32>
    %243 = arith.mulf %238, %242 : vector<1x12xf32>
    %244 = arith.addf %240, %243 : vector<1x12xf32>
    %245 = math.tanh %244 : vector<1x12xf32>
    %cst_43 = arith.constant 1.000000e+00 : f32
    %246 = vector.broadcast %cst_43 : f32 to vector<1x12xf32>
    %247 = arith.subf %246, %239 : vector<1x12xf32>
    %248 = arith.mulf %247, %245 : vector<1x12xf32>
    %249 = arith.mulf %239, %218 : vector<1x12xf32>
    %250 = arith.addf %248, %249 : vector<1x12xf32>
    %251 = vector.broadcast %250 : vector<1x12xf32> to vector<12x12xf32>
    %252 = arith.mulf %8, %251 : vector<12x12xf32>
    %cst_44 = arith.constant dense<0.000000e+00> : vector<12xf32>
    %253 = vector.multi_reduction <add>, %252, %cst_44 [1] : vector<12x12xf32> to vector<12xf32>
    %254 = vector.shape_cast %253 : vector<12xf32> to vector<12x1xf32>
    %255 = vector.broadcast %254 : vector<12x1xf32> to vector<12x128xf32>
    %256 = arith.mulf %255, %2 : vector<12x128xf32>
    %cst_45 = arith.constant dense<0.000000e+00> : vector<128xf32>
    %257 = vector.multi_reduction <add>, %256, %cst_45 [0] : vector<12x128xf32> to vector<128xf32>
    %258 = vector.shape_cast %257 : vector<128xf32> to vector<1x128xf32>
    %259 = vector.extract_strided_slice %258 {offsets = [0, 0], sizes = [1, 5], strides = [1, 1]} : vector<1x128xf32> to vector<1x5xf32>
    %260 = arith.addf %259, %3 : vector<1x5xf32>
    %cst_46 = arith.constant dense<0xFF800000> : vector<1xf32>
    %261 = vector.multi_reduction <maximumf>, %260, %cst_46 [1] : vector<1x5xf32> to vector<1xf32>
    %262 = vector.shape_cast %261 : vector<1xf32> to vector<1x1xf32>
    %263 = vector.broadcast %262 : vector<1x1xf32> to vector<1x5xf32>
    %264 = arith.subf %260, %263 : vector<1x5xf32>
    %265 = math.exp %264 : vector<1x5xf32>
    %cst_47 = arith.constant dense<0.000000e+00> : vector<1xf32>
    %266 = vector.multi_reduction <add>, %265, %cst_47 [1] : vector<1x5xf32> to vector<1xf32>
    %267 = vector.shape_cast %266 : vector<1xf32> to vector<1x1xf32>
    %268 = vector.broadcast %267 : vector<1x1xf32> to vector<1x5xf32>
    %269 = arith.divf %265, %268 : vector<1x5xf32>
    %c0_48 = arith.constant 0 : index
    %c0_49 = arith.constant 0 : index
    %270 = vector.load %arg5[%c0_48, %c0_49] : memref<1x5xf32, #tpu.memory_space<vmem>>, vector<1x5xf32>
    tpu.vector_store %arg5[%c0_48, %c0_49], %269 {strides = array<i32>} : memref<1x5xf32, #tpu.memory_space<vmem>>, vector<1x5xf32>,
    return
  }
  func.func @transform_0(%arg0: i32, %arg1: memref<8xi32, #tpu.memory_space<smem>>) -> (i32, i32) {
    %c0_i32 = arith.constant 0 : i32
    %c0_i32_0 = arith.constant 0 : i32
    %c0_i32_1 = arith.constant 0 : i32
    return %c0_i32, %c0_i32_0 : i32, i32
  }
  func.func @transform_1(%arg0: i32, %arg1: memref<8xi32, #tpu.memory_space<smem>>) -> (i32, i32) {
    %c0_i32 = arith.constant 0 : i32
    %c0_i32_0 = arith.constant 0 : i32
    %c0_i32_1 = arith.constant 0 : i32
    return %c0_i32, %c0_i32_0 : i32, i32
  }
  func.func @transform_2(%arg0: i32, %arg1: memref<8xi32, #tpu.memory_space<smem>>) -> (i32, i32) {
    %c0_i32 = arith.constant 0 : i32
    %c0_i32_0 = arith.constant 0 : i32
    %c0_i32_1 = arith.constant 0 : i32
    return %c0_i32, %c0_i32_0 : i32, i32
  }
  func.func @transform_3(%arg0: i32, %arg1: memref<8xi32, #tpu.memory_space<smem>>) -> (i32, i32) {
    %c0_i32 = arith.constant 0 : i32
    %c0_i32_0 = arith.constant 0 : i32
    %c0_i32_1 = arith.constant 0 : i32
    return %c0_i32, %c0_i32_0 : i32, i32
  }
}

</mosaic_0001>

<bundles_post_ra>
// kernel: exoghost_forward.1
= control target key start
LH: loop header
LB: loop body
LE: loop exit
PB: predicated region body
PF: predicated region fallthrough
CT: control target
= control target key end

     0   :  { %s1308_s0 = inlined_call_operand.hbm [shape: s32[8], index: 0, kind: input, shape index: {}]   ;;  %s1309_s1 = inlined_call_operand.hbm [shape: f32[8,384], index: 1, kind: input, shape index: {}]   ;;  %s1310_s2 = inlined_call_operand.hbm [shape: f32[16,384], index: 2, kind: input, shape index: {}]   ;;  %s1311_s3 = inlined_call_operand.hbm [shape: f32[16,128], index: 3, kind: input, shape index: {}]   ;;  %s1312_s4 = inlined_call_operand.hbm [shape: f32[1,5], index: 4, kind: output, shape index: {}]  }
   0x1   :  { %s927_s17 = scalar_lea.hbm %s1308_s0, 16 }
   0x2   :  { %p928_p0 = scmp.ne.s32.totalorder %s1308_s0, %s927_s17  ;;  %p931_p1 = scmp.lt.u32.totalorder %s927_s17, %s1308_s0 }
   0x4   :  { %p933_p2 = pnand %p931_p1, %p928_p0 }
   0x6   :  { %936 = shalt.err (!%p933_p2)  }
   0x7   :  { %s1033_s22 = smov [#allocation3]  }
   0x8   :  { %10 = dma.hbm_to_smem %s1308_s0, 16, %s1033_s22, [#allocation2] }
   0x9   :  { %1025 = dma.done.wait [#allocation2], 16 }
   0xa   :  { %1026 = vsyncadd [#allocation2], 4294967280 }
   0xb   :  { %12 = sfence }
   0xc   :  { %13 = vsyncpa [#allocation5], 0 }
   0xd   :  { %14 = vsyncpa [#allocation8], 0 }
   0xe   :  { %15 = vsyncpa [#allocation6], 0  ;;  %s1034_s25 = smov [#allocation7]   ;;  %s937_s29 = scalar_lea.hbm %s1310_s2, 768 }
   0xf   :  { %s31_s26 = sshll.u32 %s1034_s25, 4  ;;  %p938_p3 = scmp.ne.s32.totalorder %s1310_s2, %s937_s29  ;;  %s32_s26 = int_to_ptr.vmem [resolvable:$true] %s31_s26 }
  0x10   :  { %p941_p4 = scmp.lt.u32.totalorder %s937_s29, %s1310_s2 }
  0x12   :  { %p943_p5 = pnand %p941_p4, %p938_p3 }
  0x14   :  { %946 = shalt.err (!%p943_p5)
}
  0x15   :  { %s947_s0 = scalar_lea.vmem %s32_s26, 768  ;;  %p952_p7 = scmp.lt.s32.totalorder %s32_s26, %s32_s26 }
  0x16   :  { %p948_p6 = scmp.ne.s32.totalorder %s32_s26, %s947_s0  ;;  %p953_p8 = scmp.lt.s32.totalorder %s947_s0, %s947_s0 }
  0x18   :  { %p954_p9 = por %p953_p8, %p952_p7 }
  0x1a   :  { %p955_p10 = pnand %p954_p9, %p948_p6 }
  0x1c   :  { %958 = shalt.err (!%p955_p10)
}
  0x1d   :  { %s1035_s8 = smov 384   ;;  %s1036_s9 = smov 24  }
  0x1e   :  { %37 = dma.hbm_to_vmem [thread:$0]  %s1310_s2, 768, %s32_s26, [#allocation8], %s1035_s8, %s1035_s8, %s1036_s9  }
  0x1f   :  { %s1037_s12 = smov [#allocation4]   ;;  %s1038_s14 = smov [#allocation9]  }
  0x20   :  { %s22_s13 = sshll.u32 %s1037_s12, 4  ;;  %s43_s15 = sshll.u32 %s1038_s14, 4  ;;  %s23_s13 = int_to_ptr.vmem [resolvable:$true] %s22_s13  ;;  %s44_s15 = int_to_ptr.vmem [resolvable:$true] %s43_s15 }
  0x21   :  { %s959_s18 = scalar_lea.hbm %s1309_s1, 384 }
  0x22   :  { %p960_p11 = scmp.ne.s32.totalorder %s1309_s1, %s959_s18  ;;  %p963_p12 = scmp.lt.u32.totalorder %s959_s18, %s1309_s1 }
  0x24   :  { %p965_p13 = pnand %p963_p12, %p960_p11 }
  0x26   :  { %968 = shalt.err (!%p965_p13)
}
  0x27   :  { %s969_s2 = scalar_lea.vmem %s23_s13, 384  ;;  %p974_p1 = scmp.lt.s32.totalorder %s23_s13, %s23_s13 }
  0x28   :  { %p970_p0 = scmp.ne.s32.totalorder %s23_s13, %s969_s2  ;;  %p975_p2 = scmp.lt.s32.totalorder %s969_s2, %s969_s2 }
  0x2a   :  { %p976_p3 = por %p975_p2, %p974_p1 }
  0x2c   :  { %p977_p4 = pnand %p976_p3, %p970_p0 }
  0x2e   :  { %980 = shalt.err (!%p977_p4)
}
  0x2f   :  { %25 = dma.hbm_to_vmem [thread:$0]  %s1309_s1, 384, %s23_s13, [#allocation5]  }
  0x30   :  { %s981_s27 = scalar_lea.hbm %s1311_s3, 256 }
  0x31   :  { %p982_p5 = scmp.ne.s32.totalorder %s1311_s3, %s981_s27  ;;  %p985_p6 = scmp.lt.u32.totalorder %s981_s27, %s1311_s3 }
  0x33   :  { %p987_p7 = pnand %p985_p6, %p982_p5 }
  0x35   :  { %990 = shalt.err (!%p987_p7)
}
  0x36   :  { %s991_s6 = scalar_lea.vmem %s44_s15, 256  ;;  %p996_p9 = scmp.lt.s32.totalorder %s44_s15, %s44_s15 }
  0x37   :  { %p992_p8 = scmp.ne.s32.totalorder %s44_s15, %s991_s6  ;;  %p997_p10 = scmp.lt.s32.totalorder %s991_s6, %s991_s6 }
  0x39   :  { %p998_p11 = por %p997_p10, %p996_p9 }
  0x3b   :  { %p999_p12 = pnand %p998_p11, %p992_p8 }
  0x3d   :  { %1002 = shalt.err (!%p999_p12)
}
  0x3e   :  { %s1039_s1 = smov 128   ;;  %s1040_s7 = smov 8  }
  0x3f   :  { %49 = dma.hbm_to_vmem [thread:$0]  %s1311_s3, 256, %s44_s15, [#allocation8], %s1039_s1, %s1039_s1, %s1040_s7  }
  0x40   :  { %1027 = dma.done.wait [#allocation5], 384  }
  0x41   :  { %1028 = vsyncadd [#allocation5], 4294966912 }
  0x42   :  { %1029 = dma.done.wait [#allocation8], 1024  }
  0x43   :  { %1030 = vsyncadd [#allocation8], 4294966272  ;;  %s80_s9 = sld [smem:[#allocation3]]  ;;  %v1117_v4 = vld [vmem:[#allocation7 + $0x1c] ss:$0 sm:$0xff]  ;;  %v69_v8 = vlaneseq  ;;  %v1041_v18 = vmov 0.0  }
  0x44   :  { %vm129_vm2 = vcmask 93184   ;;  %vm125_vm3 = vcmask 97280   ;;  %v1134_v26 = vld [vmem:[#allocation7 + $0x18] sm:$0xf]  ;;  %v1136_v27 = vld [vmem:[#allocation7 + $0x20] sm:$0xf] }
  0x45   :  { %v70_v10 = vshrl.u32 %v69_v8, 7  ;;  %v73_v13 = vand.u32 127, %v69_v8  ;;  %v1140_v31 = vld [vmem:[#allocation7] sm:$0xff]  ;;  %v1142_v32 = vld [vmem:[#allocation7 + $0x8] sm:$0xff]  ;;  %vm139_vm4 = vcmask 1043456   ;;  %s843_s3 = sld [smem:[#allocation3 + $0x1]] }
  0x46   :  { %v1042_v42 = vmov 1966171168   ;;  %v1148_v51 = vld [vmem:[#allocation7 + $0x28] sm:$0xf]  ;;  %v1150_v54 = vld [vmem:[#allocation7 + $0x10] sm:$0xff]  ;;  %s846_s20 = sld [smem:[#allocation3 + $0x2]] }
  0x47   :  { %v71_v12 = vadd.s32 8, %v70_v10  ;;  %v1120_v15 = vsub.s32 0, %v70_v10  ;;  %vm74_vm1 = vcmp.eq.s32.totalorder %v70_v10, %v73_v13  ;;  %v168_v43 = vunpack.c.l.s4 %v1042_v42  ;;  %s849_s25 = sld [smem:[#allocation3 + $0x3]]  ;;  %s852_s5 = sld [smem:[#allocation3 + $0x4]] }
  0x48   :  { %v1126_v20 = vsel %vm74_vm1, 1.0, %v1041_v18  ;;  %vm786_vm5 = vcmask 32768  }
  0x49   :  { %s81_s10 = sshra.s32 %s80_s9, 3  ;;  %s84_s11 = sand.u32 7, %s80_s9  ;;  %vm75_vm0 = vcmp.eq.s32.totalorder %v71_v12, %v73_v13  ;;  %v169_v48 = vunpack.c.0.s8 %v168_v43 }
  0x4a   :  { %s841_s12 = smul.u32 24, %s81_s10  ;;  %v1124_v19 = vsel %vm75_vm0, 1.0, %v1041_v18  ;;  %s855_s9 = sld [smem:[#allocation3 + $0x5]] }
  0x4b   :  { %s108_s15 = sshra.s32 %s843_s3, 3  ;;  %s111_s17 = sand.u32 7, %s843_s3  ;;  %v1152_v55 = vsub.s32 %v169_v48, %v70_v10 }
  0x4c   :  { %s87_s13 = sadd.s32 %s841_s12, %s84_s11  ;;  %s844_s16 = smul.u32 24, %s108_s15 }
  0x4d   :  { %s88_s14 = scalar_lea.vmem [#allocation4], %s87_s13  ;;  %s204_s21 = sshra.s32 %s846_s20, 3 }
  0x4e   :  { %v89_v0 = vld [vmem:[%s88_s14] ss:$8 sm:$0x7]  ;;  %s114_s18 = sadd.s32 %s844_s16, %s111_s17  ;;  %s847_s22 = smul.u32 24, %s204_s21 }
  0x4f   :  { %v842_v1 = vmul.f32 -1.442695, %v89_v0  ;;  %v98_v5 = vrot.slane %v89_v0, 2  ;;  %s115_s19 = scalar_lea.vmem [#allocation4], %s114_s18  ;;  %s207_s2 = sand.u32 7, %s846_s20 }
  0x50   :  { %v116_v63 = vld [vmem:[%s115_s19] ss:$8 sm:$0x7]  ;;  %s210_s23 = sadd.s32 %s847_s22, %s207_s2  ;;  %s297_s26 = sshra.s32 %s849_s25, 3 }
  0x51   :  { %875 = vpow2.f32 %v842_v1  ;;  %v192_v13 = vrot.slane %v116_v63, 2  ;;  %s211_s24 = scalar_lea.vmem [#allocation4], %s210_s23  ;;  %s850_s27 = smul.u32 24, %s297_s26 }
  0x52   :  { %s300_s28 = sand.u32 7, %s849_s25  ;;  %s390_s6 = sshra.s32 %s852_s5, 3 }
  0x53   :  { %s303_s29 = sadd.s32 %s850_s27, %s300_s28  ;;  %s853_s1 = smul.u32 24, %s390_s6 }
  0x54   :  { %s304_s30 = scalar_lea.vmem [#allocation4], %s303_s29  ;;  %s393_s7 = sand.u32 7, %s852_s5 }
  0x55   :  { %s396_s0 = sadd.s32 %s853_s1, %s393_s7  ;;  %s483_s10 = sshra.s32 %s855_s9, 3 }
  0x56   :  { %s397_s8 = scalar_lea.vmem [#allocation4], %s396_s0  ;;  %s856_s11 = smul.u32 24, %s483_s10 }
  0x57   :  { %s486_s12 = sand.u32 7, %s855_s9  ;;  %s858_s3 = sld [smem:[#allocation3 + $0x6]] }
  0x58   :  { %s489_s13 = sadd.s32 %s856_s11, %s486_s12  ;;  %s861_s20 = sld [smem:[#allocation3 + $0x7]] }
  0x59   :  { %s490_s14 = scalar_lea.vmem [#allocation4], %s489_s13  ;;  %s1043_s25 = smov [#allocation10]  }
  0x5a   :  { %s805_s26 = sshll.u32 %s1043_s25, 4  ;;  %s806_s26 = int_to_ptr.vmem [resolvable:$true] %s805_s26 }
  0x5b   :  { %v876_v2 = vpop.eup %875  ;;  %s1003_s27 = scalar_lea.vmem %s806_s26, 16  ;;  %s1007_s28 = scalar_lea.vmem %s806_s26, 32 }
  0x5c   :  { %v93_v3 = vadd.f32 1.0, %v876_v2  ;;  %p1004_p13 = scmp.ne.s32.totalorder %s806_s26, %s1003_s27  ;;  %p1008_p0 = scmp.lt.s32.totalorder %s806_s26, %s806_s26 }
  0x5d   :  { %s576_s15 = sshra.s32 %s858_s3, 3  ;;  %s579_s17 = sand.u32 7, %s858_s3 }
  0x5e   :  { %877 = vrcp.f32 %v93_v3  ;;  %s859_s16 = smul.u32 24, %s576_s15  ;;  %s669_s21 = sshra.s32 %s861_s20, 3 }
  0x5f   :  { %s862_s22 = smul.u32 24, %s669_s21  ;;  %s672_s2 = sand.u32 7, %s861_s20 }
  0x60   :  { %s582_s18 = sadd.s32 %s859_s16, %s579_s17  ;;  %p1009_p1 = scmp.lt.s32.totalorder %s1007_s28, %s1003_s27 }
  0x61   :  { %s583_s19 = scalar_lea.vmem [#allocation4], %s582_s18  ;;  %s675_s23 = sadd.s32 %s862_s22, %s672_s2 }
  0x62   :  { %p1010_p2 = por %p1009_p1, %p1008_p0 }
  0x64   :  { %p1011_p3 = pnand %p1010_p2, %p1004_p13 }
  0x68   :  { %v878_v6 = vpop.eup %877 }
  0x69   :  { %v96_v7 = vmul.f32 %v878_v6, %v1117_v4  ;;  %v103_v11 = vrot.slane %v878_v6, 1 }
  0x6b   :  { %v100_v9 = vadd.f32 %v98_v5, %v96_v7  ;;  %v105_v14 = vsub.f32 1.0, %v103_v11 }
  0x6d   :  { %879 = vtanh.f32 %v100_v9 }
  0x77   :  { %v880_v16 = vpop.eup %879 }
  0x78   :  { %v1122_v17 = vmul.f32 %v880_v16, %v105_v14 }
  0x7a   :  { %v121_v21 = vrot.slane %v1122_v17, %v1120_v15 }
  0x7c   :  { %v124_v22 = vmul.f32 %v1124_v19, %v121_v21  ;;  %v123_v23 = vmul.f32 %v1126_v20, %v121_v21 }
  0x7e   :  { %v130_v24 = vsel %vm129_vm2, %v124_v22, 0.0  ;;  %v126_v25 = vsel %vm125_vm3, %v123_v23, 0.0 }
  0x7f   :  { %131 = vadd.xlane.f32.xlu0 %v130_v24 }
  0x83   :  { %127 = vadd.xlane.f32.xlu0 %v126_v25 }
 0x10c   :  { %v132_v28 = vpop.xlane.xlu0 %131 }
 0x10d   :  { %v136_v29 = vmul.f32 %v132_v28, %v1134_v26  ;;  %v137_v30 = vmul.f32 %v132_v28, %v1136_v27  ;;  %v138_v58 = vmul.f32 %v132_v28, %v1148_v51 }
 0x10f   :  { %v140_v36 = vsel %vm139_vm4, %v136_v29, 0.0  ;;  %v148_v37 = vsel %vm139_vm4, %v137_v30, 0.0  ;;  %v156_v62 = vsel %vm139_vm4, %v138_v58, 0.0 }
 0x110   :  { %v128_v33 = vpop.xlane.xlu0 %127 }
 0x111   :  { %v133_v34 = vmul.f32 %v128_v33, %v1140_v31  ;;  %v134_v35 = vmul.f32 %v128_v33, %v1142_v32  ;;  %v135_v59 = vmul.f32 %v128_v33, %v1150_v54 }
 0x113   :  { %v141_v38 = vadd.f32 %v140_v36, %v133_v34  ;;  %v149_v39 = vadd.f32 %v148_v37, %v134_v35  ;;  %v157_v0 = vadd.f32 %v156_v62, %v135_v59 }
 0x115   :  { %v142_v40 = vrot.slane %v141_v38, 4  ;;  %v150_v41 = vrot.slane %v149_v39, 4  ;;  %v158_v3 = vrot.slane %v157_v0, 4 }
 0x117   :  { %v143_v44 = vadd.f32 %v142_v40, %v141_v38  ;;  %v151_v45 = vadd.f32 %v150_v41, %v149_v39  ;;  %v159_v6 = vadd.f32 %v158_v3, %v157_v0 }
 0x119   :  { %v144_v46 = vrot.slane %v143_v44, 2  ;;  %v152_v47 = vrot.slane %v151_v45, 2  ;;  %v160_v7 = vrot.slane %v159_v6, 2 }
 0x11b   :  { %v145_v49 = vadd.f32 %v144_v46, %v143_v44  ;;  %v153_v50 = vadd.f32 %v152_v47, %v151_v45  ;;  %v161_v9 = vadd.f32 %v160_v7, %v159_v6 }
 0x11d   :  { %v146_v52 = vrot.slane %v145_v49, 1  ;;  %v154_v53 = vrot.slane %v153_v50, 1  ;;  %v162_v11 = vrot.slane %v161_v9, 1 }
 0x11f   :  { %v147_v56 = vadd.f32 %v146_v52, %v145_v49  ;;  %v155_v57 = vadd.f32 %v154_v53, %v153_v50  ;;  %v163_v12 = vadd.f32 %v162_v11, %v161_v9 }
 0x121   :  { %v166_v60 = vcombine.low %v147_v56, %v155_v57  ;;  %v189_v14 = vadd.f32 %v163_v12, %v1117_v4 }
 0x123   :  { %v173_v61 = vrot.slane %v166_v60, %v1152_v55 }
 0x125   :  { %v180_v1 = vrot.slane %v173_v61, %v1152_v55 }
 0x127   :  { %v182_v2 = vadd.f32 %v180_v1, %v116_v63 }
 0x129   :  { %v845_v5 = vmul.f32 -1.442695, %v182_v2  ;;  %v212_v2 = vld [vmem:[%s211_s24] ss:$8 sm:$0x7]  ;;  %s676_s24 = scalar_lea.vmem [#allocation4], %s675_s23 }
 0x12b   :  { %881 = vpow2.f32 %v845_v5 }
 0x135   :  { %v882_v8 = vpop.eup %881 }
 0x136   :  { %v186_v10 = vadd.f32 1.0, %v882_v8 }
 0x138   :  { %883 = vrcp.f32 %v186_v10 }
 0x142   :  { %v884_v16 = vpop.eup %883 }
 0x143   :  { %v190_v18 = vmul.f32 %v884_v16, %v189_v14  ;;  %v197_v22 = vrot.slane %v884_v16, 1 }
 0x145   :  { %v194_v21 = vadd.f32 %v192_v13, %v190_v18  ;;  %v199_v23 = vsub.f32 1.0, %v197_v22  ;;  %v201_v28 = vmul.f32 %v197_v22, %v1122_v17  ;;  %v285_v18 = vrot.slane %v212_v2, 2 }
 0x147   :  { %885 = vtanh.f32 %v194_v21 }
 0x151   :  { %v886_v24 = vpop.eup %885 }
 0x152   :  { %v200_v25 = vmul.f32 %v886_v24, %v199_v23 }
 0x154   :  { %v1161_v29 = vadd.f32 %v201_v28, %v200_v25 }
 0x156   :  { %v217_v30 = vrot.slane %v1161_v29, %v1120_v15 }
 0x158   :  { %v220_v33 = vmul.f32 %v1124_v19, %v217_v30  ;;  %v219_v35 = vmul.f32 %v1126_v20, %v217_v30 }
 0x15a   :  { %v224_v34 = vsel %vm129_vm2, %v220_v33, 0.0  ;;  %v221_v36 = vsel %vm125_vm3, %v219_v35, 0.0 }
 0x15b   :  { %225 = vadd.xlane.f32.xlu1 %v224_v34 }
 0x15f   :  { %222 = vadd.xlane.f32.xlu1 %v221_v36 }
 0x1e8   :  { %v226_v37 = vpop.xlane.xlu1 %225 }
 0x1e9   :  { %v230_v38 = vmul.f32 %v226_v37, %v1134_v26  ;;  %v231_v17 = vmul.f32 %v226_v37, %v1136_v27  ;;  %v232_v61 = vmul.f32 %v226_v37, %v1148_v51 }
 0x1eb   :  { %v233_v42 = vsel %vm139_vm4, %v230_v38, 0.0  ;;  %v241_v43 = vsel %vm139_vm4, %v231_v17, 0.0  ;;  %v249_v1 = vsel %vm139_vm4, %v232_v61, 0.0 }
 0x1ec   :  { %v223_v39 = vpop.xlane.xlu1 %222 }
 0x1ed   :  { %v227_v40 = vmul.f32 %v223_v39, %v1140_v31  ;;  %v228_v41 = vmul.f32 %v223_v39, %v1142_v32  ;;  %v229_v62 = vmul.f32 %v223_v39, %v1150_v54 }
 0x1ef   :  { %v234_v44 = vadd.f32 %v233_v42, %v227_v40  ;;  %v242_v45 = vadd.f32 %v241_v43, %v228_v41  ;;  %v250_v3 = vadd.f32 %v249_v1, %v229_v62 }
 0x1f1   :  { %v235_v46 = vrot.slane %v234_v44, 4  ;;  %v243_v47 = vrot.slane %v242_v45, 4  ;;  %v251_v7 = vrot.slane %v250_v3, 4 }
 0x1f3   :  { %v236_v48 = vadd.f32 %v235_v46, %v234_v44  ;;  %v244_v49 = vadd.f32 %v243_v47, %v242_v45  ;;  %v252_v9 = vadd.f32 %v251_v7, %v250_v3 }
 0x1f5   :  { %v237_v50 = vrot.slane %v236_v48, 2  ;;  %v245_v52 = vrot.slane %v244_v49, 2  ;;  %v253_v10 = vrot.slane %v252_v9, 2 }
 0x1f7   :  { %v238_v53 = vadd.f32 %v237_v50, %v236_v48  ;;  %v246_v56 = vadd.f32 %v245_v52, %v244_v49  ;;  %v254_v12 = vadd.f32 %v253_v10, %v252_v9 }
 0x1f9   :  { %v239_v57 = vrot.slane %v238_v53, 1  ;;  %v247_v58 = vrot.slane %v246_v56, 1  ;;  %v255_v14 = vrot.slane %v254_v12, 1 }
 0x1fb   :  { %v240_v59 = vadd.f32 %v239_v57, %v238_v53  ;;  %v248_v60 = vadd.f32 %v247_v58, %v246_v56  ;;  %v256_v16 = vadd.f32 %v255_v14, %v254_v12 }
 0x1fd   :  { %v259_v63 = vcombine.low %v240_v59, %v248_v60  ;;  %v282_v21 = vadd.f32 %v256_v16, %v1117_v4 }
 0x1ff   :  { %v266_v0 = vrot.slane %v259_v63, %v1152_v55 }
 0x201   :  { %v273_v5 = vrot.slane %v266_v0, %v1152_v55 }
 0x203   :  { %v275_v6 = vadd.f32 %v273_v5, %v212_v2 }
 0x205   :  { %v848_v8 = vmul.f32 -1.442695, %v275_v6  ;;  %v305_v6 = vld [vmem:[%s304_s30] ss:$8 sm:$0x7] }
 0x207   :  { %887 = vpow2.f32 %v848_v8 }
 0x211   :  { %v888_v11 = vpop.eup %887 }
 0x212   :  { %v279_v13 = vadd.f32 1.0, %v888_v11 }
 0x214   :  { %889 = vrcp.f32 %v279_v13 }
 0x21e   :  { %v890_v22 = vpop.eup %889 }
 0x21f   :  { %v283_v23 = vmul.f32 %v890_v22, %v282_v21  ;;  %v290_v25 = vrot.slane %v890_v22, 1 }
 0x221   :  { %v287_v24 = vadd.f32 %v285_v18, %v283_v23  ;;  %v292_v28 = vsub.f32 1.0, %v290_v25  ;;  %v294_v34 = vmul.f32 %v290_v25, %v1161_v29  ;;  %v378_v23 = vrot.slane %v305_v6, 2 }
 0x223   :  { %891 = vtanh.f32 %v287_v24 }
 0x22d   :  { %v892_v30 = vpop.eup %891 }
 0x22e   :  { %v293_v33 = vmul.f32 %v892_v30, %v292_v28 }
 0x230   :  { %v1182_v35 = vadd.f32 %v294_v34, %v293_v33 }
 0x232   :  { %v310_v36 = vrot.slane %v1182_v35, %v1120_v15 }
 0x234   :  { %v313_v37 = vmul.f32 %v1124_v19, %v310_v36  ;;  %v312_v38 = vmul.f32 %v1126_v20, %v310_v36 }
 0x236   :  { %v317_v17 = vsel %vm129_vm2, %v313_v37, 0.0  ;;  %v314_v39 = vsel %vm125_vm3, %v312_v38, 0.0 }
 0x237   :  { %318 = vadd.xlane.f32.xlu0 %v317_v17  ;;  %315 = vadd.xlane.f32.xlu1 %v314_v39 }
 0x2c4   :  { %v319_v40 = vpop.xlane.xlu0 %318  ;;  %v316_v41 = vpop.xlane.xlu1 %315 }
 0x2c5   :  { %v323_v29 = vmul.f32 %v319_v40, %v1134_v26  ;;  %v324_v42 = vmul.f32 %v319_v40, %v1136_v27  ;;  %v320_v43 = vmul.f32 %v316_v41, %v1140_v31  ;;  %v321_v44 = vmul.f32 %v316_v41, %v1142_v32 }
 0x2c6   :  { %v325_v62 = vmul.f32 %v319_v40, %v1148_v51  ;;  %v322_v1 = vmul.f32 %v316_v41, %v1150_v54 }
 0x2c7   :  { %v326_v45 = vsel %vm139_vm4, %v323_v29, 0.0  ;;  %v334_v46 = vsel %vm139_vm4, %v324_v42, 0.0 }
 0x2c8   :  { %v327_v47 = vadd.f32 %v326_v45, %v320_v43  ;;  %v335_v48 = vadd.f32 %v334_v46, %v321_v44  ;;  %v342_v3 = vsel %vm139_vm4, %v325_v62, 0.0 }
 0x2c9   :  { %v343_v7 = vadd.f32 %v342_v3, %v322_v1 }
 0x2ca   :  { %v328_v49 = vrot.slane %v327_v47, 4  ;;  %v336_v50 = vrot.slane %v335_v48, 4 }
 0x2cb   :  { %v344_v10 = vrot.slane %v343_v7, 4 }
 0x2cc   :  { %v329_v52 = vadd.f32 %v328_v49, %v327_v47  ;;  %v337_v53 = vadd.f32 %v336_v50, %v335_v48 }
 0x2cd   :  { %v345_v12 = vadd.f32 %v344_v10, %v343_v7 }
 0x2ce   :  { %v330_v56 = vrot.slane %v329_v52, 2  ;;  %v338_v57 = vrot.slane %v337_v53, 2 }
 0x2cf   :  { %v346_v13 = vrot.slane %v345_v12, 2 }
 0x2d0   :  { %v331_v58 = vadd.f32 %v330_v56, %v329_v52  ;;  %v339_v59 = vadd.f32 %v338_v57, %v337_v53 }
 0x2d1   :  { %v347_v16 = vadd.f32 %v346_v13, %v345_v12 }
 0x2d2   :  { %v332_v60 = vrot.slane %v331_v58, 1  ;;  %v340_v61 = vrot.slane %v339_v59, 1 }
 0x2d3   :  { %v348_v21 = vrot.slane %v347_v16, 1 }
 0x2d4   :  { %v333_v63 = vadd.f32 %v332_v60, %v331_v58  ;;  %v341_v0 = vadd.f32 %v340_v61, %v339_v59 }
 0x2d5   :  { %v349_v22 = vadd.f32 %v348_v21, %v347_v16 }
 0x2d6   :  { %v352_v2 = vcombine.low %v333_v63, %v341_v0 }
 0x2d7   :  { %v375_v24 = vadd.f32 %v349_v22, %v1117_v4 }
 0x2d8   :  { %v359_v5 = vrot.slane %v352_v2, %v1152_v55 }
 0x2da   :  { %v366_v8 = vrot.slane %v359_v5, %v1152_v55 }
 0x2dc   :  { %v368_v9 = vadd.f32 %v366_v8, %v305_v6 }
 0x2de   :  { %v851_v11 = vmul.f32 -1.442695, %v368_v9  ;;  %v398_v9 = vld [vmem:[%s397_s8] ss:$8 sm:$0x7] }
 0x2e0   :  { %893 = vpow2.f32 %v851_v11 }
 0x2ea   :  { %v894_v14 = vpop.eup %893 }
 0x2eb   :  { %v372_v18 = vadd.f32 1.0, %v894_v14 }
 0x2ed   :  { %895 = vrcp.f32 %v372_v18 }
 0x2f7   :  { %v896_v25 = vpop.eup %895 }
 0x2f8   :  { %v376_v28 = vmul.f32 %v896_v25, %v375_v24  ;;  %v383_v33 = vrot.slane %v896_v25, 1 }
 0x2fa   :  { %v380_v30 = vadd.f32 %v378_v23, %v376_v28  ;;  %v385_v34 = vsub.f32 1.0, %v383_v33  ;;  %v387_v38 = vmul.f32 %v383_v33, %v1182_v35  ;;  %v471_v28 = vrot.slane %v398_v9, 2 }
 0x2fc   :  { %897 = vtanh.f32 %v380_v30 }
 0x306   :  { %v898_v36 = vpop.eup %897 }
 0x307   :  { %v386_v37 = vmul.f32 %v898_v36, %v385_v34 }
 0x309   :  { %v1203_v17 = vadd.f32 %v387_v38, %v386_v37 }
 0x30b   :  { %v403_v39 = vrot.slane %v1203_v17, %v1120_v15 }
 0x30d   :  { %v406_v40 = vmul.f32 %v1124_v19, %v403_v39  ;;  %v405_v41 = vmul.f32 %v1126_v20, %v403_v39 }
 0x30f   :  { %v410_v29 = vsel %vm129_vm2, %v406_v40, 0.0  ;;  %v407_v42 = vsel %vm125_vm3, %v405_v41, 0.0 }
 0x310   :  { %411 = vadd.xlane.f32.xlu0 %v410_v29  ;;  %408 = vadd.xlane.f32.xlu1 %v407_v42 }
 0x39d   :  { %v412_v43 = vpop.xlane.xlu0 %411  ;;  %v409_v44 = vpop.xlane.xlu1 %408 }
 0x39e   :  { %v416_v35 = vmul.f32 %v412_v43, %v1134_v26  ;;  %v417_v45 = vmul.f32 %v412_v43, %v1136_v27  ;;  %v413_v46 = vmul.f32 %v409_v44, %v1140_v31  ;;  %v414_v47 = vmul.f32 %v409_v44, %v1142_v32 }
 0x39f   :  { %v418_v1 = vmul.f32 %v412_v43, %v1148_v51  ;;  %v415_v5 = vmul.f32 %v409_v44, %v1150_v54 }
 0x3a0   :  { %v419_v48 = vsel %vm139_vm4, %v416_v35, 0.0  ;;  %v427_v49 = vsel %vm139_vm4, %v417_v45, 0.0 }
 0x3a1   :  { %v420_v50 = vadd.f32 %v419_v48, %v413_v46  ;;  %v428_v52 = vadd.f32 %v427_v49, %v414_v47  ;;  %v435_v7 = vsel %vm139_vm4, %v418_v1, 0.0 }
 0x3a2   :  { %v436_v10 = vadd.f32 %v435_v7, %v415_v5 }
 0x3a3   :  { %v421_v53 = vrot.slane %v420_v50, 4  ;;  %v429_v56 = vrot.slane %v428_v52, 4 }
 0x3a4   :  { %v437_v13 = vrot.slane %v436_v10, 4 }
 0x3a5   :  { %v422_v57 = vadd.f32 %v421_v53, %v420_v50  ;;  %v430_v58 = vadd.f32 %v429_v56, %v428_v52 }
 0x3a6   :  { %v438_v16 = vadd.f32 %v437_v13, %v436_v10 }
 0x3a7   :  { %v423_v59 = vrot.slane %v422_v57, 2  ;;  %v431_v60 = vrot.slane %v430_v58, 2 }
 0x3a8   :  { %v439_v18 = vrot.slane %v438_v16, 2 }
 0x3a9   :  { %v424_v61 = vadd.f32 %v423_v59, %v422_v57  ;;  %v432_v62 = vadd.f32 %v431_v60, %v430_v58 }
 0x3aa   :  { %v440_v22 = vadd.f32 %v439_v18, %v438_v16 }
 0x3ab   :  { %v425_v63 = vrot.slane %v424_v61, 1  ;;  %v433_v0 = vrot.slane %v432_v62, 1 }
 0x3ac   :  { %v441_v24 = vrot.slane %v440_v22, 1 }
 0x3ad   :  { %v426_v2 = vadd.f32 %v425_v63, %v424_v61  ;;  %v434_v3 = vadd.f32 %v433_v0, %v432_v62 }
 0x3ae   :  { %v442_v25 = vadd.f32 %v441_v24, %v440_v22 }
 0x3af   :  { %v445_v6 = vcombine.low %v426_v2, %v434_v3 }
 0x3b0   :  { %v468_v30 = vadd.f32 %v442_v25, %v1117_v4 }
 0x3b1   :  { %v452_v8 = vrot.slane %v445_v6, %v1152_v55 }
 0x3b3   :  { %v459_v11 = vrot.slane %v452_v8, %v1152_v55 }
 0x3b5   :  { %v461_v12 = vadd.f32 %v459_v11, %v398_v9 }
 0x3b7   :  { %v854_v14 = vmul.f32 -1.442695, %v461_v12  ;;  %v491_v12 = vld [vmem:[%s490_s14] ss:$8 sm:$0x7] }
 0x3b9   :  { %899 = vpow2.f32 %v854_v14 }
 0x3c3   :  { %v900_v21 = vpop.eup %899 }
 0x3c4   :  { %v465_v23 = vadd.f32 1.0, %v900_v21 }
 0x3c6   :  { %901 = vrcp.f32 %v465_v23 }
 0x3d0   :  { %v902_v33 = vpop.eup %901 }
 0x3d1   :  { %v469_v34 = vmul.f32 %v902_v33, %v468_v30  ;;  %v476_v37 = vrot.slane %v902_v33, 1 }
 0x3d3   :  { %v473_v36 = vadd.f32 %v471_v28, %v469_v34  ;;  %v478_v38 = vsub.f32 1.0, %v476_v37  ;;  %v480_v41 = vmul.f32 %v476_v37, %v1203_v17  ;;  %v564_v34 = vrot.slane %v491_v12, 2 }
 0x3d5   :  { %903 = vtanh.f32 %v473_v36 }
 0x3df   :  { %v904_v39 = vpop.eup %903 }
 0x3e0   :  { %v479_v40 = vmul.f32 %v904_v39, %v478_v38 }
 0x3e2   :  { %v1224_v29 = vadd.f32 %v480_v41, %v479_v40 }
 0x3e4   :  { %v496_v42 = vrot.slane %v1224_v29, %v1120_v15 }
 0x3e6   :  { %v499_v43 = vmul.f32 %v1124_v19, %v496_v42  ;;  %v498_v44 = vmul.f32 %v1126_v20, %v496_v42 }
 0x3e8   :  { %v503_v35 = vsel %vm129_vm2, %v499_v43, 0.0  ;;  %v500_v45 = vsel %vm125_vm3, %v498_v44, 0.0 }
 0x3e9   :  { %504 = vadd.xlane.f32.xlu0 %v503_v35  ;;  %501 = vadd.xlane.f32.xlu1 %v500_v45 }
 0x476   :  { %v505_v46 = vpop.xlane.xlu0 %504  ;;  %v502_v47 = vpop.xlane.xlu1 %501 }
 0x477   :  { %v509_v17 = vmul.f32 %v505_v46, %v1134_v26  ;;  %v510_v48 = vmul.f32 %v505_v46, %v1136_v27  ;;  %v506_v49 = vmul.f32 %v502_v47, %v1140_v31  ;;  %v507_v50 = vmul.f32 %v502_v47, %v1142_v32 }
 0x478   :  { %v511_v5 = vmul.f32 %v505_v46, %v1148_v51  ;;  %v508_v8 = vmul.f32 %v502_v47, %v1150_v54 }
 0x479   :  { %v512_v52 = vsel %vm139_vm4, %v509_v17, 0.0  ;;  %v520_v53 = vsel %vm139_vm4, %v510_v48, 0.0 }
 0x47a   :  { %v513_v56 = vadd.f32 %v512_v52, %v506_v49  ;;  %v521_v57 = vadd.f32 %v520_v53, %v507_v50  ;;  %v528_v10 = vsel %vm139_vm4, %v511_v5, 0.0 }
 0x47b   :  { %v529_v13 = vadd.f32 %v528_v10, %v508_v8 }
 0x47c   :  { %v514_v58 = vrot.slane %v513_v56, 4  ;;  %v522_v59 = vrot.slane %v521_v57, 4 }
 0x47d   :  { %v530_v18 = vrot.slane %v529_v13, 4 }
 0x47e   :  { %v515_v60 = vadd.f32 %v514_v58, %v513_v56  ;;  %v523_v61 = vadd.f32 %v522_v59, %v521_v57 }
 0x47f   :  { %v531_v22 = vadd.f32 %v530_v18, %v529_v13 }
 0x480   :  { %v516_v62 = vrot.slane %v515_v60, 2  ;;  %v524_v63 = vrot.slane %v523_v61, 2 }
 0x481   :  { %v532_v23 = vrot.slane %v531_v22, 2 }
 0x482   :  { %v517_v0 = vadd.f32 %v516_v62, %v515_v60  ;;  %v525_v1 = vadd.f32 %v524_v63, %v523_v61 }
 0x483   :  { %v533_v25 = vadd.f32 %v532_v23, %v531_v22 }
 0x484   :  { %v518_v2 = vrot.slane %v517_v0, 1  ;;  %v526_v3 = vrot.slane %v525_v1, 1 }
 0x485   :  { %v534_v30 = vrot.slane %v533_v25, 1 }
 0x486   :  { %v519_v6 = vadd.f32 %v518_v2, %v517_v0  ;;  %v527_v7 = vadd.f32 %v526_v3, %v525_v1 }
 0x487   :  { %v535_v33 = vadd.f32 %v534_v30, %v533_v25 }
 0x488   :  { %v538_v9 = vcombine.low %v519_v6, %v527_v7 }
 0x489   :  { %v561_v36 = vadd.f32 %v535_v33, %v1117_v4 }
 0x48a   :  { %v545_v11 = vrot.slane %v538_v9, %v1152_v55 }
 0x48c   :  { %v552_v14 = vrot.slane %v545_v11, %v1152_v55 }
 0x48e   :  { %v554_v16 = vadd.f32 %v552_v14, %v491_v12 }
 0x490   :  { %v857_v21 = vmul.f32 -1.442695, %v554_v16  ;;  %v584_v16 = vld [vmem:[%s583_s19] ss:$8 sm:$0x7] }
 0x492   :  { %905 = vpow2.f32 %v857_v21 }
 0x49c   :  { %v906_v24 = vpop.eup %905 }
 0x49d   :  { %v558_v28 = vadd.f32 1.0, %v906_v24 }
 0x49f   :  { %907 = vrcp.f32 %v558_v28 }
 0x4a9   :  { %v908_v37 = vpop.eup %907 }
 0x4aa   :  { %v562_v38 = vmul.f32 %v908_v37, %v561_v36  ;;  %v569_v40 = vrot.slane %v908_v37, 1 }
 0x4ac   :  { %v566_v39 = vadd.f32 %v564_v34, %v562_v38  ;;  %v571_v41 = vsub.f32 1.0, %v569_v40  ;;  %v573_v44 = vmul.f32 %v569_v40, %v1224_v29  ;;  %v657_v38 = vrot.slane %v584_v16, 2 }
 0x4ae   :  { %909 = vtanh.f32 %v566_v39 }
 0x4b8   :  { %v910_v42 = vpop.eup %909 }
 0x4b9   :  { %v572_v43 = vmul.f32 %v910_v42, %v571_v41 }
 0x4bb   :  { %v1245_v35 = vadd.f32 %v573_v44, %v572_v43 }
 0x4bd   :  { %v589_v45 = vrot.slane %v1245_v35, %v1120_v15 }
 0x4bf   :  { %v592_v46 = vmul.f32 %v1124_v19, %v589_v45  ;;  %v591_v47 = vmul.f32 %v1126_v20, %v589_v45 }
 0x4c1   :  { %v596_v17 = vsel %vm129_vm2, %v592_v46, 0.0  ;;  %v593_v48 = vsel %vm125_vm3, %v591_v47, 0.0 }
 0x4c2   :  { %597 = vadd.xlane.f32.xlu0 %v596_v17  ;;  %594 = vadd.xlane.f32.xlu1 %v593_v48 }
 0x54f   :  { %v598_v49 = vpop.xlane.xlu0 %597  ;;  %v595_v50 = vpop.xlane.xlu1 %594 }
 0x550   :  { %v602_v29 = vmul.f32 %v598_v49, %v1134_v26  ;;  %v603_v52 = vmul.f32 %v598_v49, %v1136_v27  ;;  %v599_v53 = vmul.f32 %v595_v50, %v1140_v31  ;;  %v600_v56 = vmul.f32 %v595_v50, %v1142_v32 }
 0x551   :  { %v604_v8 = vmul.f32 %v598_v49, %v1148_v51  ;;  %v601_v11 = vmul.f32 %v595_v50, %v1150_v54 }
 0x552   :  { %v605_v57 = vsel %vm139_vm4, %v602_v29, 0.0  ;;  %v613_v58 = vsel %vm139_vm4, %v603_v52, 0.0 }
 0x553   :  { %v606_v59 = vadd.f32 %v605_v57, %v599_v53  ;;  %v614_v60 = vadd.f32 %v613_v58, %v600_v56  ;;  %v621_v13 = vsel %vm139_vm4, %v604_v8, 0.0 }
 0x554   :  { %v622_v18 = vadd.f32 %v621_v13, %v601_v11 }
 0x555   :  { %v607_v61 = vrot.slane %v606_v59, 4  ;;  %v615_v62 = vrot.slane %v614_v60, 4 }
 0x556   :  { %v623_v23 = vrot.slane %v622_v18, 4 }
 0x557   :  { %v608_v63 = vadd.f32 %v607_v61, %v606_v59  ;;  %v616_v0 = vadd.f32 %v615_v62, %v614_v60 }
 0x558   :  { %v624_v25 = vadd.f32 %v623_v23, %v622_v18 }
 0x559   :  { %v609_v1 = vrot.slane %v608_v63, 2  ;;  %v617_v2 = vrot.slane %v616_v0, 2 }
 0x55a   :  { %v625_v28 = vrot.slane %v624_v25, 2 }
 0x55b   :  { %v610_v3 = vadd.f32 %v609_v1, %v608_v63  ;;  %v618_v5 = vadd.f32 %v617_v2, %v616_v0 }
 0x55c   :  { %v626_v33 = vadd.f32 %v625_v28, %v624_v25 }
 0x55d   :  { %v611_v6 = vrot.slane %v610_v3, 1  ;;  %v619_v7 = vrot.slane %v618_v5, 1 }
 0x55e   :  { %v627_v36 = vrot.slane %v626_v33, 1 }
 0x55f   :  { %v612_v9 = vadd.f32 %v611_v6, %v610_v3  ;;  %v620_v10 = vadd.f32 %v619_v7, %v618_v5 }
 0x560   :  { %v628_v37 = vadd.f32 %v627_v36, %v626_v33 }
 0x561   :  { %v631_v12 = vcombine.low %v612_v9, %v620_v10 }
 0x562   :  { %v654_v39 = vadd.f32 %v628_v37, %v1117_v4 }
 0x563   :  { %v638_v14 = vrot.slane %v631_v12, %v1152_v55 }
 0x565   :  { %v645_v21 = vrot.slane %v638_v14, %v1152_v55  ;;  %v677_v14 = vld [vmem:[%s676_s24] ss:$8 sm:$0x7] }
 0x567   :  { %v647_v22 = vadd.f32 %v645_v21, %v584_v16 }
 0x569   :  { %v860_v24 = vmul.f32 -1.442695, %v647_v22 }
 0x56b   :  { %911 = vpow2.f32 %v860_v24 }
 0x575   :  { %v912_v30 = vpop.eup %911 }
 0x576   :  { %v651_v34 = vadd.f32 1.0, %v912_v30 }
 0x578   :  { %913 = vrcp.f32 %v651_v34  ;;  %v750_v34 = vrot.slane %v677_v14, 2 }
 0x582   :  { %v914_v40 = vpop.eup %913 }
 0x583   :  { %v655_v41 = vmul.f32 %v914_v40, %v654_v39  ;;  %v662_v43 = vrot.slane %v914_v40, 1 }
 0x585   :  { %v659_v42 = vadd.f32 %v657_v38, %v655_v41  ;;  %v664_v44 = vsub.f32 1.0, %v662_v43  ;;  %v666_v47 = vmul.f32 %v662_v43, %v1245_v35 }
 0x587   :  { %915 = vtanh.f32 %v659_v42 }
 0x591   :  { %v916_v45 = vpop.eup %915 }
 0x592   :  { %v665_v46 = vmul.f32 %v916_v45, %v664_v44 }
 0x594   :  { %v1266_v17 = vadd.f32 %v666_v47, %v665_v46 }
 0x596   :  { %v682_v48 = vrot.slane %v1266_v17, %v1120_v15 }
 0x598   :  { %v685_v49 = vmul.f32 %v1124_v19, %v682_v48  ;;  %v684_v50 = vmul.f32 %v1126_v20, %v682_v48 }
 0x59a   :  { %v689_v29 = vsel %vm129_vm2, %v685_v49, 0.0  ;;  %v686_v52 = vsel %vm125_vm3, %v684_v50, 0.0  ;;  %v67_v49 = vld [vmem:[#allocation9 + $0x8] sm:$0xf]  ;;  %v66_v50 = vld [vmem:[#allocation9] sm:$0xff] }
 0x59b   :  { %690 = vadd.xlane.f32.xlu0 %v689_v29  ;;  %687 = vadd.xlane.f32.xlu1 %v686_v52 }
 0x628   :  { %v691_v53 = vpop.xlane.xlu0 %690  ;;  %v688_v56 = vpop.xlane.xlu1 %687 }
 0x629   :  { %v695_v35 = vmul.f32 %v691_v53, %v1134_v26  ;;  %v696_v57 = vmul.f32 %v691_v53, %v1136_v27  ;;  %v692_v58 = vmul.f32 %v688_v56, %v1140_v31  ;;  %v693_v59 = vmul.f32 %v688_v56, %v1142_v32 }
 0x62a   :  { %v697_v32 = vmul.f32 %v691_v53, %v1148_v51  ;;  %v694_v10 = vmul.f32 %v688_v56, %v1150_v54 }
 0x62b   :  { %v698_v60 = vsel %vm139_vm4, %v695_v35, 0.0  ;;  %v706_v61 = vsel %vm139_vm4, %v696_v57, 0.0 }
 0x62c   :  { %v699_v62 = vadd.f32 %v698_v60, %v692_v58  ;;  %v707_v63 = vadd.f32 %v706_v61, %v693_v59  ;;  %v714_v12 = vsel %vm139_vm4, %v697_v32, 0.0  ;;  %v68_v59 = vld [vmem:[#allocation9 + $0xc] sm:$0x1] }
 0x62d   :  { %v715_v16 = vadd.f32 %v714_v12, %v694_v10 }
 0x62e   :  { %v700_v0 = vrot.slane %v699_v62, 4  ;;  %v708_v1 = vrot.slane %v707_v63, 4 }
 0x62f   :  { %v716_v22 = vrot.slane %v715_v16, 4 }
 0x630   :  { %v701_v2 = vadd.f32 %v700_v0, %v699_v62  ;;  %v709_v3 = vadd.f32 %v708_v1, %v707_v63 }
 0x631   :  { %v717_v51 = vadd.f32 %v716_v22, %v715_v16 }
 0x632   :  { %v702_v5 = vrot.slane %v701_v2, 2  ;;  %v710_v6 = vrot.slane %v709_v3, 2 }
 0x633   :  { %v718_v24 = vrot.slane %v717_v51, 2 }
 0x634   :  { %v703_v26 = vadd.f32 %v702_v5, %v701_v2  ;;  %v711_v27 = vadd.f32 %v710_v6, %v709_v3 }
 0x635   :  { %v719_v28 = vadd.f32 %v718_v24, %v717_v51 }
 0x636   :  { %v704_v31 = vrot.slane %v703_v26, 1  ;;  %v712_v7 = vrot.slane %v711_v27, 1 }
 0x637   :  { %v720_v54 = vrot.slane %v719_v28, 1 }
 0x638   :  { %v705_v8 = vadd.f32 %v704_v31, %v703_v26  ;;  %v713_v9 = vadd.f32 %v712_v7, %v711_v27 }
 0x639   :  { %v721_v33 = vadd.f32 %v720_v54, %v719_v28 }
 0x63a   :  { %v724_v11 = vcombine.low %v705_v8, %v713_v9 }
 0x63b   :  { %v747_v36 = vadd.f32 %v721_v33, %v1117_v4 }
 0x63c   :  { %v731_v13 = vrot.slane %v724_v11, %v1152_v55 }
 0x63e   :  { %v738_v18 = vrot.slane %v731_v13, %v1152_v55 }
 0x640   :  { %v740_v21 = vadd.f32 %v738_v18, %v677_v14 }
 0x642   :  { %v863_v23 = vmul.f32 -1.442695, %v740_v21 }
 0x644   :  { %917 = vpow2.f32 %v863_v23 }
 0x64e   :  { %v918_v25 = vpop.eup %917 }
 0x64f   :  { %v744_v30 = vadd.f32 1.0, %v918_v25 }
 0x651   :  { %919 = vrcp.f32 %v744_v30 }
 0x65b   :  { %v920_v37 = vpop.eup %919 }
 0x65c   :  { %v748_v38 = vmul.f32 %v920_v37, %v747_v36  ;;  %v755_v55 = vrot.slane %v920_v37, 1 }
 0x65e   :  { %v752_v39 = vadd.f32 %v750_v34, %v748_v38  ;;  %v757_v40 = vsub.f32 1.0, %v755_v55  ;;  %v759_v43 = vmul.f32 %v755_v55, %v1266_v17 }
 0x660   :  { %921 = vtanh.f32 %v752_v39 }
 0x66a   :  { %v922_v41 = vpop.eup %921 }
 0x66b   :  { %v758_v42 = vmul.f32 %v922_v41, %v757_v40 }
 0x66d   :  { %v760_v44 = vadd.f32 %v759_v43, %v758_v42 }
 0x66f   :  { %v765_v45 = vrot.slane %v760_v44, %v1120_v15 }
 0x671   :  { %v768_v46 = vmul.f32 %v1124_v19, %v765_v45  ;;  %v767_v47 = vmul.f32 %v1126_v20, %v765_v45 }
 0x673   :  { %v772_v48 = vsel %vm129_vm2, %v768_v46, 0.0  ;;  %v769_v4 = vsel %vm125_vm3, %v767_v47, 0.0 }
 0x674   :  { %773 = vadd.xlane.f32.xlu0 %v772_v48  ;;  %770 = vadd.xlane.f32.xlu1 %v769_v4 }
 0x701   :  { %v774_v29 = vpop.xlane.xlu0 %773  ;;  %v771_v52 = vpop.xlane.xlu1 %770 }
 0x702   :  { %v776_v53 = vmul.f32 %v774_v29, %v67_v49  ;;  %v775_v56 = vmul.f32 %v771_v52, %v66_v50 }
 0x704   :  { %v777_v17 = vsel %vm139_vm4, %v776_v53, 0.0 }
 0x705   :  { %v778_v35 = vadd.f32 %v777_v17, %v775_v56 }
 0x707   :  { %v779_v15 = vrot.slane %v778_v35, 4 }
 0x709   :  { %v780_v57 = vadd.f32 %v779_v15, %v778_v35 }
 0x70b   :  { %v781_v19 = vrot.slane %v780_v57, 2 }
 0x70d   :  { %v782_v58 = vadd.f32 %v781_v19, %v780_v57 }
 0x70f   :  { %v783_v20 = vrot.slane %v782_v58, 1 }
 0x711   :  { %v784_v60 = vadd.f32 %v783_v20, %v782_v58 }
 0x713   :  { %v785_v61 = vadd.f32 %v784_v60, %v68_v59 }
 0x715   :  { %v787_v62 = vsel %vm786_vm5, %v785_v61, -inf }
 0x716   :  { %788 = vmax.xlane.f32.xlu0 %v787_v62 }
 0x7a3   :  { %v789_v63 = vpop.xlane.xlu0 %788 }
 0x7a4   :  { %v790_v0 = vsub.f32 %v785_v61, %v789_v63 }
 0x7a6   :  { %v791_v1 = vmul.f32 1.442695, %v790_v0 }
 0x7a8   :  { %923 = vpow2.f32 %v791_v1 }
 0x7b2   :  { %v924_v2 = vpop.eup %923 }
 0x7b3   :  { %v793_v3 = vsel %vm786_vm5, %v924_v2, 0.0 }
 0x7b4   :  { %794 = vadd.xlane.f32.xlu1 %v793_v3 }
 0x841   :  { %v795_v5 = vpop.xlane.xlu1 %794 }
 0x842   :  { %925 = vrcp.f32 %v795_v5 }
 0x84c   :  { %v926_v6 = vpop.eup %925 }
 0x84d   :  { %v797_v26 = vmul.f32 %v926_v6, %v924_v2 }
 0x84f   :  { %798 = vst.msk [vmem:[#allocation10] sm:$0x1] %vm786_vm5, %v797_v26 }
 0x850   :  { %1014 = shalt.err (!%p1011_p3)
}
 0x851   :  { %s1015_s5 = scalar_lea.hbm %s1312_s4, 16 }
 0x852   :  { %p1016_p4 = scmp.ne.s32.totalorder %s1312_s4, %s1015_s5  ;;  %p1019_p5 = scmp.lt.u32.totalorder %s1015_s5, %s1312_s4 }
 0x854   :  { %p1021_p6 = pnand %p1019_p5, %p1016_p4 }
 0x856   :  { %1024 = shalt.err (!%p1021_p6)
}
 0x857   :  { %808 = dma.vmem_to_hbm [thread:$0]  %s806_s26, 16, %s1312_s4, [#allocation6]  }
 0x858   :  { %1031 = dma.done.wait [#allocation6], 16  }
 0x859   :  { %1032 = vsyncadd [#allocation6], 4294967280 }
 0x85a   :  { %812 = vsyncpa [#allocation5], 1 }
 0x85b   :  { %813 = vsyncpa [#allocation8], 1 }
 0x85c   :  { %814 = vsyncpa [#allocation6], 1 }

</bundles_post_ra>
